<compile_context>
chip_gen: v7x
topology: tpu7x:2x2x1
jax: 0.10.0
libtpu: 0.0.40
codegen_flags: <defaults>
</compile_context>

<pallas_src>
from functools import partial

import jax
import jax.numpy as jnp
from jax.experimental import pallas as pl
from jax.experimental.pallas import tpu as pltpu


_BN_EPS = 1e-5


# ------------------------------ Pallas kernel ------------------------------ #

def _upscaling_kernel(x_ref, w1_ref, wtap_ref, w3_ref, bias_ref, o_ref, buf_ref,
                      *, nblk, hp):
    """Whole UpScaling block for `nblk` images, fully VMEM/vreg resident.

    Row-pair layout: spatial (H, W) x C activations are stored as (H//2, 2*W*C).

      x_ref    : (1, M, K1)      bf16  [x2 | x1] lane-concat, M = nblk*Hp
      w1_ref   : (K1, Lo)        bf16  convT+pad+concat+conv1+BN1 fused weight
      wtap_ref : (3*Lo, Lo)      bf16  conv2 taps [p-1; p; p+1] K-stacked (BN2 folded)
      w3_ref   : (Lo, Lo)        bf16  conv3 (1x1) weight (BN3 folded)
      bias_ref : (3, 1, Lo)      f32   per-stage BN-folded biases
      o_ref    : (1, M, Lo)      f32   output, Lo = 2*W2*Cout
      buf_ref  : (nblk, hp+2, Lo) f32  scratch for the +-1 packed-row shift
    """
    bf = w1_ref.dtype
    m = nblk * hp
    lo = o_ref.shape[-1]

    x = x_ref[0]                                            # (m, K1) bf16

    # Stage 1: ConvTranspose2d(k=2,s=2) + pad + concat + conv1(1x1) + BN1 + ReLU
    # folded into a single matmul (skip and upsample weight blocks K-stacked).
    pre1 = jnp.dot(x, w1_ref[...], preferred_element_type=jnp.float32)
    o1 = jnp.maximum(pre1 + bias_ref[0], 0.0)               # (m, lo) f32

    # Stage 2: conv2(3x3, pad=1) + BN2 + ReLU as ONE matmul over the
    # lane-concatenated [prev-row | row | next-row] packed taps.  The +-1
    # packed-row shift with per-image zero padding is done by staging o1 in a
    # (nblk, hp+2, lo) scratch with zeroed boundary rows and reading two
    # statically shifted windows.
    buf_ref[:, 0:1, :] = jnp.zeros((nblk, 1, lo), jnp.float32)
    buf_ref[:, hp + 1:hp + 2, :] = jnp.zeros((nblk, 1, lo), jnp.float32)
    buf_ref[:, 1:hp + 1, :] = o1.reshape(nblk, hp, lo)
    o1_up = buf_ref[:, 0:hp, :].reshape(m, lo)              # o1[p-1], zero at image top
    o1_dn = buf_ref[:, 2:hp + 2, :].reshape(m, lo)          # o1[p+1], zero at image bottom
    x_tap = jnp.concatenate(
        [o1_up.astype(bf), o1.astype(bf), o1_dn.astype(bf)], axis=-1)  # (m, 3*lo)
    pre2 = jnp.dot(x_tap, wtap_ref[...], preferred_element_type=jnp.float32)
    o2 = jnp.maximum(pre2 + bias_ref[1], 0.0)               # (m, lo) f32

    # Stage 3: conv3(1x1) + BN3 + ReLU.
    pre3 = jnp.dot(o2.astype(bf), w3_ref[...], preferred_element_type=jnp.float32)
    o_ref[0] = jnp.maximum(pre3 + bias_ref[2], 0.0).astype(o_ref.dtype)


@partial(jax.jit, static_argnames=("num_groups",))
def upscaling_forward(packed, x1_nhwc, x2_nhwc, *, num_groups=1):
    """x1_nhwc: (N, H1, W1, Cin), x2_nhwc: (N, H2, W2, Cs) -> (N, H2, W2, Cout)."""
    N, H1, W1, Cin = x1_nhwc.shape
    _, H2, W2, Cs = x2_nhwc.shape
    Lo = packed["w3"].shape[-1]
    Co = Lo // (2 * W2)
    Hp = H2 // 2
    K1 = 2 * W2 * Cs + W1 * Cin
    assert H2 == 2 * H1 and W2 == 2 * W1, "fused layout assumes diffY == diffX == 0"
    # TODO(synk): general F.pad offsets (x2 not exactly 2x of x1) are not handled
    # by the fused row-pair layout.

    G = int(num_groups)
    assert N % G == 0, "num_groups must divide the batch"
    Nblk = N // G
    M = Nblk * Hp

    # Host glue: row-major reshapes + one lane concat + bf16 cast.
    x2_l = x2_nhwc.reshape(N, Hp, 2 * W2 * Cs)
    x1_l = x1_nhwc.reshape(N, H1, W1 * Cin)
    x_cat = jnp.concatenate([x2_l, x1_l], axis=-1).astype(jnp.bfloat16)  # (N, Hp, K1)
    x_cat = x_cat.reshape(G, M, K1)                                      # batch stacked

    kernel = partial(_upscaling_kernel, nblk=Nblk, hp=Hp)
    out = pl.pallas_call(
        kernel,
        out_shape=jax.ShapeDtypeStruct((G, M, Lo), jnp.float32),
        grid=(G,),
        in_specs=[
            pl.BlockSpec((1, M, K1), lambda g: (g, 0, 0)),
            pl.BlockSpec((K1, Lo), lambda g: (0, 0)),          # resident weight
            pl.BlockSpec((3 * Lo, Lo), lambda g: (0, 0)),      # resident weight
            pl.BlockSpec((Lo, Lo), lambda g: (0, 0)),          # resident weight
            pl.BlockSpec((3, 1, Lo), lambda g: (0, 0, 0)),     # resident biases
        ],
        out_specs=pl.BlockSpec((1, M, Lo), lambda g: (g, 0, 0)),
        scratch_shapes=[pltpu.VMEM((Nblk, Hp + 2, Lo), jnp.float32)],
        compiler_params=pltpu.CompilerParams(
            dimension_semantics=("parallel",),
            vmem_limit_bytes=32 * 1024 * 1024),
    )(x_cat, packed["w1"], packed["wtap"], packed["w3"], packed["bias"])
    return out.reshape(N, H2, W2, Co)


def _pick_num_groups(batch):
    """2 parallel grid steps on 2-TensorCore chips (v7x), else one big step."""
    try:
        kind = jax.devices()[0].device_kind.lower()
    except Exception:
        kind = ""
    if batch >= 2 and batch % 2 == 0 and ("v7" in kind or "7x" in kind):
        return 2
    return 1


# ------------------------- parameter construction ------------------------- #

def _bn_fold(key, c):
    """Deterministic BatchNorm params folded to (scale, shift) for eval mode."""
    k1, k2, k3, k4 = jax.random.split(key, 4)
    gamma = 1.0 + 0.1 * jax.random.normal(k1, (c,), jnp.float32)
    beta = 0.1 * jax.random.normal(k2, (c,), jnp.float32)
    mean = 0.1 * jax.random.normal(k3, (c,), jnp.float32)
    var = 1.0 + 0.1 * jax.random.uniform(k4, (c,), jnp.float32)
    scale = gamma / jnp.sqrt(var + _BN_EPS)
    shift = beta - mean * scale
    return scale, shift


def init_params(key, in_channels, out_channels):
    """Raw parameters in PyTorch layouts (ConvTranspose2d / Conv2d / BN2d)."""
    ks = jax.random.split(key, 8)
    up_w = 0.1 * jax.random.normal(ks[0], (in_channels, out_channels, 2, 2),
                                   jnp.float32)
    up_b = 0.1 * jax.random.normal(ks[1], (out_channels,), jnp.float32)
    w1 = 0.1 * jax.random.normal(ks[2], (out_channels, in_channels, 1, 1),
                                 jnp.float32)
    s1, t1 = _bn_fold(ks[3], out_channels)
    w2 = 0.1 * jax.random.normal(ks[4], (out_channels, out_channels, 3, 3),
                                 jnp.float32)
    s2, t2 = _bn_fold(ks[5], out_channels)
    w3 = 0.1 * jax.random.normal(ks[6], (out_channels, out_channels, 1, 1),
                                 jnp.float32)
    s3, t3 = _bn_fold(ks[7], out_channels)
    return dict(up_w=up_w, up_b=up_b, w1=w1, s1=s1, t1=t1,
                w2=w2, s2=s2, t2=t2, w3=w3, s3=s3, t3=t3)


def pack_params(p, x1_shape, x2_shape):
    """Repack raw params into row-pair-layout block matrices (done once at init)."""
    _, H1, W1, Cin = x1_shape
    _, H2, W2, Cs_in = x2_shape
    Co = p["up_b"].shape[0]
    Cs = p["w1"].shape[1] - Co
    assert Cs == Cs_in and H2 == 2 * H1 and W2 == 2 * W1 and H2 % 2 == 0
    Lo = 2 * W2 * Co

    w1mat = p["w1"][:, :, 0, 0].T               # (Cs+Co, Co), [cin, o]
    w1_skip, w1_up = w1mat[:Cs], w1mat[Cs:]
    w2t = jnp.transpose(p["w2"], (2, 3, 1, 0))  # (3, 3, Co, Co), [dy, dx, c, o]
    w3mat = p["w3"][:, :, 0, 0].T               # (Co, Co)
    s1, t1 = p["s1"], p["t1"]
    s2, t2 = p["s2"], p["t2"]
    s3, t3 = p["s3"], p["t3"]
    eye_sw = jnp.eye(2 * W2, dtype=jnp.float32)

    # Stage 1, skip path: block-diagonal 1x1 conv over x2's channels (BN1 folded).
    wskip = jnp.kron(eye_sw, w1_skip * s1[None, :])                 # (2*W2*Cs, Lo)

    # Stage 1, upsample path: ConvTranspose(k2,s2) folded through conv1 (1x1).
    wup = jnp.zeros((W1 * Cin, Lo), jnp.float32)
    for di in range(2):          # output sub-row inside a pair
        for dj in range(2):      # output sub-column
            comb = p["up_w"][:, :, di, dj] @ w1_up                  # (Cin, Co)
            sel = jnp.zeros((W1, W2), jnp.float32).at[
                jnp.arange(W1), 2 * jnp.arange(W1) + dj].set(1.0)
            wup = wup.at[:, di * W2 * Co:(di + 1) * W2 * Co].add(
                jnp.kron(sel, comb * s1[None, :]))
    b1 = jnp.tile((p["up_b"] @ w1_up) * s1 + t1, 2 * W2)

    # Stage 2: 3x3 conv as three packed-row taps; column shift + zero padding
    # baked into the block structure, BN2 scale folded into columns.
    taps = []
    for dp in (-1, 0, 1):
        m = jnp.zeros((Lo, Lo), jnp.float32)
        for sp in range(2):      # source sub-row inside a pair
            for so in range(2):  # output sub-row inside a pair
                dy = 2 * dp + sp - so + 1
                if dy < 0 or dy > 2:
                    continue
                for dx in range(3):
                    sel = jnp.eye(W2, k=1 - dx, dtype=jnp.float32)  # [w_src, w_out]
                    m = m.at[sp * W2 * Co:(sp + 1) * W2 * Co,
                             so * W2 * Co:(so + 1) * W2 * Co].add(
                        jnp.kron(sel, w2t[dy, dx] * s2[None, :]))
        taps.append(m)
    b2 = jnp.tile(t2, 2 * W2)

    # Stage 3: block-diagonal 1x1 conv (BN3 scale folded).
    w3l = jnp.kron(eye_sw, w3mat * s3[None, :])
    b3 = jnp.tile(t3, 2 * W2)

    return dict(
        w1=jnp.concatenate([wskip, wup], axis=0).astype(jnp.bfloat16),   # (K1, Lo)
        wtap=jnp.concatenate(taps, axis=0).astype(jnp.bfloat16),         # (3*Lo, Lo)
        w3=w3l.astype(jnp.bfloat16),                                     # (Lo, Lo)
        bias=jnp.stack([b1, b2, b3])[:, None, :].astype(jnp.float32),    # (3, 1, Lo)
    )


# ------------------------- pure-JAX f32 reference -------------------------- #

def upscaling_reference(p, x1_nhwc, x2_nhwc):
    """Pure-JAX f32 reference of the same module (eval-mode BN), NHWC layout."""
    N, H1, W1, _ = x1_nhwc.shape
    _, H2, W2, _ = x2_nhwc.shape
    Co = p["up_b"].shape[0]

    y = jnp.einsum("nijc,coyx->niyjxo", x1_nhwc, p["up_w"])
    y = y.reshape(N, 2 * H1, 2 * W1, Co) + p["up_b"]
    dY, dX = H2 - 2 * H1, W2 - 2 * W1
    y = jnp.pad(y, ((0, 0), (dY // 2, dY - dY // 2),
                    (dX // 2, dX - dX // 2), (0, 0)))
    x = jnp.concatenate([x2_nhwc, y], axis=-1)

    o1 = jax.nn.relu(jnp.einsum("nhwc,co->nhwo", x, p["w1"][:, :, 0, 0].T)
                     * p["s1"] + p["t1"])
    w2t = jnp.transpose(p["w2"], (2, 3, 1, 0))
    xp = jnp.pad(o1, ((0, 0), (1, 1), (1, 1), (0, 0)))
    pre2 = sum(jnp.einsum("nhwc,co->nhwo",
                          xp[:, dy:dy + H2, dx:dx + W2, :], w2t[dy, dx])
               for dy in range(3) for dx in range(3))
    o2 = jax.nn.relu(pre2 * p["s2"] + p["t2"])
    o3 = jax.nn.relu(jnp.einsum("nhwc,co->nhwo", o2, p["w3"][:, :, 0, 0].T)
                     * p["s3"] + p["t3"])
    return o3


# ---------------------------------- main ----------------------------------- #

if __name__ == "__main__":
    in_channels, out_channels = 8, 4
    key = jax.random.PRNGKey(0)
    kp, kx1, kx2 = jax.random.split(key, 3)

    params = init_params(kp, in_channels, out_channels)

    # PyTorch-equivalent inputs (NCHW: x1=[2,8,8,8], x2=[2,4,16,16]) in NHWC.
    x1 = jax.random.normal(kx1, (2, 8, 8, in_channels), jnp.float32)
    x2 = jax.random.normal(kx2, (2, 16, 16, in_channels - out_channels),
                           jnp.float32)

    packed = pack_params(params, x1.shape, x2.shape)
    num_groups = _pick_num_groups(x1.shape[0])

    out = upscaling_forward(packed, x1, x2, num_groups=num_groups)
    out = jax.block_until_ready(out)
    assert out.shape == (2, 16, 16, out_channels), out.shape
    assert bool(jnp.all(out >= 0.0))  # final ReLU

    # Numerical check against a pure-JAX f32 reference (kernel uses bf16 inputs).
    ref = upscaling_reference(params, x1, x2)
    err = float(jnp.max(jnp.abs(out - ref)))
    assert err < 5e-2, f"max abs err vs reference: {err}"
    print("KERNEL_OK")
</pallas_src>

<mosaic_0001>
module attributes {stable_mosaic.version = 11 : i64} {
  func.func @_upscaling_kernel(%arg0: i32, %arg1: memref<1x16x192xbf16, #tpu.memory_space<vmem>>, %arg2: memref<192x128xbf16, #tpu.memory_space<vmem>>, %arg3: memref<384x128xbf16, #tpu.memory_space<vmem>>, %arg4: memref<128x128xbf16, #tpu.memory_space<vmem>>, %arg5: memref<3x1x128xf32, #tpu.memory_space<vmem>>, %arg6: memref<1x16x128xf32, #tpu.memory_space<vmem>>, %arg7: memref<2x10x128xf32, #tpu.memory_space<vmem>>) attributes {dimension_semantics = [#tpu.dimension_semantics<parallel>], iteration_bounds = array<i64: 1>, scalar_prefetch = 0 : i64, scratch_operands = 1 : i64, tpu.core_type = #tpu.core_type<tc>, window_params = [{transform_indices = @transform_0, window_bounds = array<i64: 1, 16, 192>}, {pipeline_mode = #tpu.pipeline_mode<synchronous>, transform_indices = @transform_1, window_bounds = array<i64: 192, 128>}, {pipeline_mode = #tpu.pipeline_mode<synchronous>, transform_indices = @transform_2, window_bounds = array<i64: 384, 128>}, {pipeline_mode = #tpu.pipeline_mode<synchronous>, transform_indices = @transform_3, window_bounds = array<i64: 128, 128>}, {pipeline_mode = #tpu.pipeline_mode<synchronous>, transform_indices = @transform_4, window_bounds = array<i64: 3, 1, 128>}, {transform_indices = @transform_5, window_bounds = array<i64: 1, 16, 128>}]} {
    %c0 = arith.constant 0 : index
    %c0_0 = arith.constant 0 : index
    %c0_1 = arith.constant 0 : index
    %0 = vector.load %arg1[%c0, %c0_0, %c0_1] : memref<1x16x192xbf16, #tpu.memory_space<vmem>>, vector<1x16x192xbf16>
    %1 = vector.shape_cast %0 : vector<1x16x192xbf16> to vector<16x192xbf16>
    %c0_2 = arith.constant 0 : index
    %c0_3 = arith.constant 0 : index
    %2 = vector.load %arg2[%c0_2, %c0_3] : memref<192x128xbf16, #tpu.memory_space<vmem>>, vector<192x128xbf16>
    %cst = arith.constant dense<0.000000e+00> : vector<16x128xf32>
    %3 = tpu.matmul %1, %2, %cst {dimension_numbers = #tpu.dot_dimension_numbers<[1], [0], [0], [1], [0, 0, 1, 1], [], []>} : vector<16x192xbf16>, vector<192x128xbf16>, vector<16x128xf32> -> vector<16x128xf32>
    %c0_4 = arith.constant 0 : index
    %c0_5 = arith.constant 0 : index
    %c0_6 = arith.constant 0 : index
    %4 = vector.load %arg5[%c0_4, %c0_5, %c0_6] : memref<3x1x128xf32, #tpu.memory_space<vmem>>, vector<1x1x128xf32>
    %5 = vector.shape_cast %4 : vector<1x1x128xf32> to vector<1x128xf32>
    %6 = vector.broadcast %5 : vector<1x128xf32> to vector<16x128xf32>
    %7 = arith.addf %3, %6 : vector<16x128xf32>
    %cst_7 = arith.constant 0.000000e+00 : f32
    %8 = vector.broadcast %cst_7 : f32 to vector<16x128xf32>
    %9 = arith.maximumf %7, %8 : vector<16x128xf32>
    %cst_8 = arith.constant 0.000000e+00 : f32
    %10 = vector.broadcast %cst_8 : f32 to vector<2x1x128xf32>
    %c0_9 = arith.constant 0 : index
    %c0_10 = arith.constant 0 : index
    %c0_11 = arith.constant 0 : index
    %11 = vector.load %arg7[%c0_9, %c0_10, %c0_11] : memref<2x10x128xf32, #tpu.memory_space<vmem>>, vector<2x1x128xf32>
    tpu.vector_store %arg7[%c0_9, %c0_10, %c0_11], %10 {strides = array<i32>} : memref<2x10x128xf32, #tpu.memory_space<vmem>>, vector<2x1x128xf32>,
    %cst_12 = arith.constant 0.000000e+00 : f32
    %12 = vector.broadcast %cst_12 : f32 to vector<2x1x128xf32>
    %c0_13 = arith.constant 0 : index
    %c9 = arith.constant 9 : index
    %c0_14 = arith.constant 0 : index
    %13 = vector.load %arg7[%c0_13, %c9, %c0_14] : memref<2x10x128xf32, #tpu.memory_space<vmem>>, vector<2x1x128xf32>
    tpu.vector_store %arg7[%c0_13, %c9, %c0_14], %12 {strides = array<i32>} : memref<2x10x128xf32, #tpu.memory_space<vmem>>, vector<2x1x128xf32>,
    %14 = vector.shape_cast %9 : vector<16x128xf32> to vector<2x8x128xf32>
    %c0_15 = arith.constant 0 : index
    %c1 = arith.constant 1 : index
    %c0_16 = arith.constant 0 : index
    %15 = vector.load %arg7[%c0_15, %c1, %c0_16] : memref<2x10x128xf32, #tpu.memory_space<vmem>>, vector<2x8x128xf32>
    tpu.vector_store %arg7[%c0_15, %c1, %c0_16], %14 {strides = array<i32>} : memref<2x10x128xf32, #tpu.memory_space<vmem>>, vector<2x8x128xf32>,
    %c0_17 = arith.constant 0 : index
    %c0_18 = arith.constant 0 : index
    %c0_19 = arith.constant 0 : index
    %16 = vector.load %arg7[%c0_17, %c0_18, %c0_19] : memref<2x10x128xf32, #tpu.memory_space<vmem>>, vector<2x8x128xf32>
    %17 = vector.shape_cast %16 : vector<2x8x128xf32> to vector<16x128xf32>
    %c0_20 = arith.constant 0 : index
    %c2 = arith.constant 2 : index
    %c0_21 = arith.constant 0 : index
    %18 = vector.load %arg7[%c0_20, %c2, %c0_21] : memref<2x10x128xf32, #tpu.memory_space<vmem>>, vector<2x8x128xf32>
    %19 = vector.shape_cast %18 : vector<2x8x128xf32> to vector<16x128xf32>
    %20 = arith.truncf %17 : vector<16x128xf32> to vector<16x128xbf16>
    %21 = arith.truncf %9 : vector<16x128xf32> to vector<16x128xbf16>
    %22 = arith.truncf %19 : vector<16x128xf32> to vector<16x128xbf16>
    %23 = tpu.concatenate %20, %21, %22 in 1 : vector<16x128xbf16>, vector<16x128xbf16>, vector<16x128xbf16> -> vector<16x384xbf16>
    %c0_22 = arith.constant 0 : index
    %c0_23 = arith.constant 0 : index
    %24 = vector.load %arg3[%c0_22, %c0_23] : memref<384x128xbf16, #tpu.memory_space<vmem>>, vector<384x128xbf16>
    %cst_24 = arith.constant dense<0.000000e+00> : vector<16x128xf32>
    %25 = tpu.matmul %23, %24, %cst_24 {dimension_numbers = #tpu.dot_dimension_numbers<[1], [0], [0], [1], [0, 0, 1, 1], [], []>} : vector<16x384xbf16>, vector<384x128xbf16>, vector<16x128xf32> -> vector<16x128xf32>
    %c1_25 = arith.constant 1 : index
    %c0_26 = arith.constant 0 : index
    %c0_27 = arith.constant 0 : index
    %26 = vector.load %arg5[%c1_25, %c0_26, %c0_27] : memref<3x1x128xf32, #tpu.memory_space<vmem>>, vector<1x1x128xf32>
    %27 = vector.shape_cast %26 : vector<1x1x128xf32> to vector<1x128xf32>
    %28 = vector.broadcast %27 : vector<1x128xf32> to vector<16x128xf32>
    %29 = arith.addf %25, %28 : vector<16x128xf32>
    %cst_28 = arith.constant 0.000000e+00 : f32
    %30 = vector.broadcast %cst_28 : f32 to vector<16x128xf32>
    %31 = arith.maximumf %29, %30 : vector<16x128xf32>
    %32 = arith.truncf %31 : vector<16x128xf32> to vector<16x128xbf16>
    %c0_29 = arith.constant 0 : index
    %c0_30 = arith.constant 0 : index
    %33 = vector.load %arg4[%c0_29, %c0_30] : memref<128x128xbf16, #tpu.memory_space<vmem>>, vector<128x128xbf16>
    %cst_31 = arith.constant dense<0.000000e+00> : vector<16x128xf32>
    %34 = tpu.matmul %32, %33, %cst_31 {dimension_numbers = #tpu.dot_dimension_numbers<[1], [0], [0], [1], [0, 0, 1, 1], [], []>} : vector<16x128xbf16>, vector<128x128xbf16>, vector<16x128xf32> -> vector<16x128xf32>
    %c2_32 = arith.constant 2 : index
    %c0_33 = arith.constant 0 : index
    %c0_34 = arith.constant 0 : index
    %35 = vector.load %arg5[%c2_32, %c0_33, %c0_34] : memref<3x1x128xf32, #tpu.memory_space<vmem>>, vector<1x1x128xf32>
    %36 = vector.shape_cast %35 : vector<1x1x128xf32> to vector<1x128xf32>
    %37 = vector.broadcast %36 : vector<1x128xf32> to vector<16x128xf32>
    %38 = arith.addf %34, %37 : vector<16x128xf32>
    %cst_35 = arith.constant 0.000000e+00 : f32
    %39 = vector.broadcast %cst_35 : f32 to vector<16x128xf32>
    %40 = arith.maximumf %38, %39 : vector<16x128xf32>
    %c0_36 = arith.constant 0 : index
    %c0_37 = arith.constant 0 : index
    %c0_38 = arith.constant 0 : index
    %41 = vector.load %arg6[%c0_36, %c0_37, %c0_38] : memref<1x16x128xf32, #tpu.memory_space<vmem>>, vector<1x16x128xf32>
    %42 = vector.shape_cast %41 : vector<1x16x128xf32> to vector<16x128xf32>
    %43 = vector.shape_cast %40 : vector<16x128xf32> to vector<1x16x128xf32>
    tpu.vector_store %arg6[%c0_36, %c0_37, %c0_38], %43 {strides = array<i32>} : memref<1x16x128xf32, #tpu.memory_space<vmem>>, vector<1x16x128xf32>,
    return
  }
  func.func @transform_0(%arg0: i32) -> (i32, i32, i32) {
    %c0_i32 = arith.constant 0 : i32
    %c0_i32_0 = arith.constant 0 : i32
    %c0_i32_1 = arith.constant 0 : i32
    return %arg0, %c0_i32, %c0_i32_0 : i32, i32, i32
  }
  func.func @transform_1(%arg0: i32) -> (i32, i32) {
    %c0_i32 = arith.constant 0 : i32
    %c0_i32_0 = arith.constant 0 : i32
    %c0_i32_1 = arith.constant 0 : i32
    return %c0_i32, %c0_i32_0 : i32, i32
  }
  func.func @transform_2(%arg0: i32) -> (i32, i32) {
    %c0_i32 = arith.constant 0 : i32
    %c0_i32_0 = arith.constant 0 : i32
    %c0_i32_1 = arith.constant 0 : i32
    return %c0_i32, %c0_i32_0 : i32, i32
  }
  func.func @transform_3(%arg0: i32) -> (i32, i32) {
    %c0_i32 = arith.constant 0 : i32
    %c0_i32_0 = arith.constant 0 : i32
    %c0_i32_1 = arith.constant 0 : i32
    return %c0_i32, %c0_i32_0 : i32, i32
  }
  func.func @transform_4(%arg0: i32) -> (i32, i32, i32) {
    %c0_i32 = arith.constant 0 : i32
    %c0_i32_0 = arith.constant 0 : i32
    %c0_i32_1 = arith.constant 0 : i32
    %c0_i32_2 = arith.constant 0 : i32
    return %c0_i32, %c0_i32_0, %c0_i32_1 : i32, i32, i32
  }
  func.func @transform_5(%arg0: i32) -> (i32, i32, i32) {
    %c0_i32 = arith.constant 0 : i32
    %c0_i32_0 = arith.constant 0 : i32
    %c0_i32_1 = arith.constant 0 : i32
    return %arg0, %c0_i32, %c0_i32_0 : i32, i32, i32
  }
}

</mosaic_0001>

<bundles_post_ra>
// kernel: upscaling_forward.1
= control target key start
LH: loop header
LB: loop body
LE: loop exit
PB: predicated region body
PF: predicated region fallthrough
CT: control target
= control target key end

     0   :  { %v783_v0 = vmov 0   ;;  %vm135_vm0 = vcmask 523264   ;;  %v784_v27 = vmov 0.0   ;;  %vm785_vm1 = vmmov 0   ;;  %s993_s1 = inlined_call_operand.vmem [shape: bf16[192,128], index: 1, kind: input, shape index: {}]   ;;  %s994_s0 = inlined_call_operand.vmem [shape: bf16[1,16,192], index: 0, kind: input, shape index: {}]   ;;  %s995_s2 = inlined_call_operand.vmem [shape: bf16[384,128], index: 2, kind: input, shape index: {}]   ;;  %s996_s4 = inlined_call_operand.vmem [shape: f32[3,1,128], index: 4, kind: input, shape index: {}]   ;;  %s997_s3 = inlined_call_operand.vmem [shape: bf16[128,128], index: 3, kind: input, shape index: {}]   ;;  %s998_s5 = inlined_call_operand.vmem [shape: f32[1,16,128], index: 5, kind: output, shape index: {}]  }
   0x1   :  { %139 = vmatprep.subr.bf16.mxu0 %v783_v0  ;;  %v736_v1 = vld [vmem:[%s993_s1] sm:$0xff]   ;;  %v737_v2 = vld [vmem:[%s993_s1 + $0x8] sm:$0xff]   ;;  %v738_v3 = vld [vmem:[%s993_s1 + $0x10] sm:$0xff]   ;;  %182 = vst [vmem:[#allocation2] sm:$0x1] %v784_v27 }
   0x2   :  { %140 = vmatpush1.bf16.msra.mxu0 %v736_v1  ;;  %v739_v4 = vld [vmem:[%s993_s1 + $0x18] sm:$0xff]   ;;  %v740_v5 = vld [vmem:[%s993_s1 + $0x20] sm:$0xff]   ;;  %v741_v9 = vld [vmem:[%s993_s1 + $0x28] sm:$0xff]   ;;  %183 = vst [vmem:[#allocation2 + $0x10] sm:$0x1] %v784_v27 }
   0x3   :  { %141 = vmatprep.subr.bf16.mxu0 %v783_v0  ;;  %v750_v6 = vld [vmem:[%s994_s0 + $0x4] ss:$8 sps:$4 sm:$0xff]   ;;  %v755_v12 = vld [vmem:[%s995_s2 + $0x50] sm:$0xff]   ;;  %v757_v15 = vld [vmem:[%s995_s2 + $0x58] sm:$0xff]   ;;  %184 = vst [vmem:[#allocation2 + $0x9] sm:$0x1] %v784_v27 }
   0x4   :  { %v751_v7 = vld [vmem:[%s995_s2 + $0x40] sm:$0xff]   ;;  %616 = vmatprep.mubr.msk.bf16.mxu0 %vm135_vm0, %v750_v6  ;;  %v753_v10 = vld [vmem:[%s995_s2 + $0x48] sm:$0xff]   ;;  %v742_v13 = vld [vmem:[%s993_s1 + $0x30] sm:$0xff]   ;;  %185 = vst [vmem:[#allocation2 + $0x19] sm:$0x1] %v784_v27 }
   0x5   :  { %v752_v8 = vld [vmem:[%s995_s2] sm:$0xff]   ;;  %653 = vmatprep.subr.bf16.mxu1 %v751_v7  ;;  %v754_v11 = vld [vmem:[%s995_s2 + $0x8] sm:$0xff]   ;;  %v756_v14 = vld [vmem:[%s995_s2 + $0x10] sm:$0xff]  }
   0x6   :  { %142 = vmatpush1.bf16.msra.mxu0 %v737_v2  ;;  %654 = vmatpush3.bf16.msra.mxu1 %v752_v8  ;;  %v758_v16 = vld [vmem:[%s995_s2 + $0x18] sm:$0xff]   ;;  %v744_v18 = vld [vmem:[%s993_s1 + $0x40] sm:$0xff]   ;;  %v745_v19 = vld [vmem:[%s993_s1 + $0x48] sm:$0xff]  }
   0x7   :  { %143 = vmatprep.subr.bf16.mxu0 %v783_v0  ;;  %655 = vmatprep.subr.bf16.mxu1 %v753_v10  ;;  %v743_v17 = vld [vmem:[%s993_s1 + $0x38] sm:$0xff]   ;;  %v746_v20 = vld [vmem:[%s993_s1 + $0x50] sm:$0xff]   ;;  %v748_v22 = vld [vmem:[%s994_s0] ss:$8 sps:$4 sm:$0xff]  }
   0x8   :  { %v747_v21 = vld [vmem:[%s993_s1 + $0x58] sm:$0xff]   ;;  %v759_v23 = vld [vmem:[%s995_s2 + $0x60] sm:$0xff]   ;;  %v761_v25 = vld [vmem:[%s995_s2 + $0x68] sm:$0xff]  }
   0x9   :  { %v760_v24 = vld [vmem:[%s995_s2 + $0x20] sm:$0xff]   ;;  %v762_v26 = vld [vmem:[%s995_s2 + $0x28] sm:$0xff]   ;;  %v763_v28 = vld [vmem:[%s995_s2 + $0x70] sm:$0xff]  }
   0xa   :  { %144 = vmatpush1.bf16.msra.mxu0 %v738_v3  ;;  %656 = vmatpush3.bf16.msra.mxu1 %v754_v11  ;;  %v764_v29 = vld [vmem:[%s995_s2 + $0x30] sm:$0xff]   ;;  %v765_v30 = vld [vmem:[%s995_s2 + $0x78] sm:$0xff]   ;;  %v601_v32 = vld [vmem:[%s996_s4] ss:$0 sm:$0xff] }
   0xb   :  { %145 = vmatprep.subr.bf16.mxu0 %v783_v0  ;;  %657 = vmatprep.subr.bf16.mxu1 %v755_v12  ;;  %v766_v31 = vld [vmem:[%s995_s2 + $0x38] sm:$0xff]   ;;  %v767_v44 = vld [vmem:[%s995_s2 + $0x80] sm:$0xff]   ;;  %v768_v46 = vld [vmem:[%s995_s2 + $0x88] sm:$0xff]  }
   0xc   :  { %v769_v47 = vld [vmem:[%s995_s2 + $0x90] sm:$0xff]   ;;  %v770_v48 = vld [vmem:[%s995_s2 + $0x98] sm:$0xff]   ;;  %v771_v49 = vld [vmem:[%s995_s2 + $0xa0] sm:$0xff]  }
   0xd   :  { %v772_v50 = vld [vmem:[%s995_s2 + $0xa8] sm:$0xff]   ;;  %v773_v51 = vld [vmem:[%s995_s2 + $0xb0] sm:$0xff]   ;;  %v774_v52 = vld [vmem:[%s995_s2 + $0xb8] sm:$0xff]  }
   0xe   :  { %146 = vmatpush1.bf16.msra.mxu0 %v739_v4  ;;  %658 = vmatpush3.bf16.msra.mxu1 %v756_v14  ;;  %v775_v56 = vld [vmem:[%s997_s3] sm:$0xff]   ;;  %v776_v57 = vld [vmem:[%s997_s3 + $0x8] sm:$0xff]   ;;  %v777_v58 = vld [vmem:[%s997_s3 + $0x10] sm:$0xff]  }
   0xf   :  { %147 = vmatprep.subr.bf16.mxu0 %v783_v0  ;;  %659 = vmatprep.subr.bf16.mxu1 %v757_v15  ;;  %v778_v59 = vld [vmem:[%s997_s3 + $0x18] sm:$0xff]   ;;  %v779_v60 = vld [vmem:[%s997_s3 + $0x20] sm:$0xff]   ;;  %v780_v61 = vld [vmem:[%s997_s3 + $0x28] sm:$0xff]  }
  0x10   :  { %v781_v62 = vld [vmem:[%s997_s3 + $0x30] sm:$0xff]   ;;  %v782_v63 = vld [vmem:[%s997_s3 + $0x38] sm:$0xff]   ;;  %v618_v6 = vld [vmem:[%s996_s4 + $0x1] ss:$0 sm:$0xff] }
  0x12   :  { %148 = vmatpush1.bf16.msra.mxu0 %v740_v5  ;;  %660 = vmatpush3.bf16.msra.mxu1 %v758_v16 }
  0x13   :  { %149 = vmatprep.subr.bf16.mxu0 %v783_v0  ;;  %661 = vmatprep.subr.bf16.mxu1 %v759_v23 }
  0x16   :  { %150 = vmatpush1.bf16.msra.mxu0 %v741_v9  ;;  %662 = vmatpush3.bf16.msra.mxu1 %v760_v24 }
  0x17   :  { %151 = vmatprep.subr.bf16.mxu0 %v783_v0  ;;  %663 = vmatprep.subr.bf16.mxu1 %v761_v25 }
  0x1a   :  { %152 = vmatpush1.bf16.msra.mxu0 %v742_v13  ;;  %664 = vmatpush3.bf16.msra.mxu1 %v762_v26 }
  0x1b   :  { %153 = vmatprep.subr.bf16.mxu0 %v783_v0  ;;  %665 = vmatprep.subr.bf16.mxu1 %v763_v28 }
  0x1e   :  { %154 = vmatpush1.bf16.msra.mxu0 %v743_v17  ;;  %666 = vmatpush3.bf16.msra.mxu1 %v764_v29 }
  0x1f   :  { %155 = vmatprep.subr.bf16.mxu0 %v783_v0  ;;  %667 = vmatprep.subr.bf16.mxu1 %v765_v30 }
  0x22   :  { %156 = vmatpush1.bf16.msra.mxu0 %v744_v18  ;;  %668 = vmatpush3.bf16.msra.mxu1 %v766_v31  ;;  %v644_v18 = vld [vmem:[%s996_s4 + $0x2] ss:$0 sm:$0xff] }
  0x23   :  { %157 = vmatprep.subr.bf16.mxu0 %v783_v0  ;;  %693 = vmatprep.subr.bf16.mxu1 %v784_v27 }
  0x26   :  { %158 = vmatpush1.bf16.msra.mxu0 %v745_v19 }
  0x27   :  { %159 = vmatprep.subr.bf16.mxu0 %v783_v0 }
  0x2a   :  { %160 = vmatpush1.bf16.msra.mxu0 %v746_v20 }
  0x2b   :  { %161 = vmatprep.subr.bf16.mxu0 %v783_v0 }
  0x2e   :  { %162 = vmatpush1.bf16.msra.mxu0 %v747_v21 }
  0x2f   :  { %713 = vmatprep.subr.bf16.mxu0 %v784_v27 }
  0x31   :  { %172 = vmatmul.mubr.bf16.vlgmr.msra.gmra.mrb[0].mxu0 %v748_v22 }
  0x32   :  { %729 = vmatprep.mubr.msk.bf16.mxu0 %vm785_vm1, %v784_v27  ;;  %714 = vmatpush3.bf16.msra.mxu0 %v775_v56 }
  0x33   :  { %715 = vmatprep.subr.bf16.mxu0 %v784_v27 }
  0x36   :  { %716 = vmatpush3.bf16.msra.mxu0 %v776_v57 }
  0x37   :  { %717 = vmatprep.subr.bf16.mxu0 %v784_v27 }
  0x3a   :  { %718 = vmatpush3.bf16.msra.mxu0 %v777_v58 }
  0x3b   :  { %719 = vmatprep.subr.bf16.mxu0 %v784_v27 }
  0x3e   :  { %720 = vmatpush3.bf16.msra.mxu0 %v778_v59 }
  0x3f   :  { %721 = vmatprep.subr.bf16.mxu0 %v784_v27 }
  0x42   :  { %722 = vmatpush3.bf16.msra.mxu0 %v779_v60 }
  0x43   :  { %723 = vmatprep.subr.bf16.mxu0 %v784_v27 }
  0x46   :  { %724 = vmatpush3.bf16.msra.mxu0 %v780_v61 }
  0x47   :  { %725 = vmatprep.subr.bf16.mxu0 %v784_v27 }
  0x4a   :  { %726 = vmatpush3.bf16.msra.mxu0 %v781_v62 }
  0x4b   :  { %727 = vmatprep.subr.bf16.mxu0 %v784_v27 }
  0x4e   :  { %728 = vmatpush3.bf16.msra.mxu0 %v782_v63 }
 0x104   :  { %v173_v33 = vpop.f32.mrb[0].mxu0 }
 0x105   :  { %v174_v34 = vadd.f32 %v601_v32, %v173_v33  ;;  %v175_v35 = vpop.f32.mrb[1].mxu0 }
 0x106   :  { %v176_v36 = vpop.f32.mrb[2].mxu0 }
 0x107   :  { %v180_v37 = vmax.f32 %v174_v34, 0.0  ;;  %v177_v38 = vadd.f32 %v601_v32, %v176_v36  ;;  %v178_v39 = vpop.f32.mrb[3].mxu0 }
 0x109   :  { %186 = vst [vmem:[#allocation2 + $0x1] sm:$0xff] %v180_v37  ;;  %v181_v40 = vmax.f32 %v177_v38, 0.0 }
 0x10b   :  { %187 = vst [vmem:[#allocation2 + $0x11] sm:$0xff] %v181_v40  ;;  %v193_v41 = vpack.c.bf16 %v181_v40, %v180_v37 }
 0x10d   :  { %427 = vmatprep.mubr.bf16.mxu1 %v193_v41 }
 0x110   :  { %v188_v42 = vld [vmem:[#allocation2] sm:$0xff] }
 0x111   :  { %v190_v54 = vld [vmem:[#allocation2 + $0x2] sm:$0xff] }
 0x112   :  { %v189_v43 = vld [vmem:[#allocation2 + $0x10] sm:$0xff] }
 0x113   :  { %v192_v45 = vpack.c.bf16 %v189_v43, %v188_v42  ;;  %v191_v53 = vld [vmem:[#allocation2 + $0x12] sm:$0xff] }
 0x114   :  { %v194_v55 = vpack.c.bf16 %v191_v53, %v190_v54 }
 0x115   :  { %428 = vmatmul.mubr.bf16.vlgmr.msra.gmra.mrb[0].mxu1 %v192_v45 }
 0x116   :  { %694 = vmatpush3.bf16.msra.mxu1 %v767_v44  ;;  %709 = vmatprep.mubr.msk.bf16.mxu1 %vm785_vm1, %v784_v27 }
 0x117   :  { %695 = vmatprep.subr.bf16.mxu1 %v784_v27 }
 0x11a   :  { %696 = vmatpush3.bf16.msra.mxu1 %v768_v46 }
 0x11b   :  { %697 = vmatprep.subr.bf16.mxu1 %v784_v27 }
 0x11e   :  { %698 = vmatpush3.bf16.msra.mxu1 %v769_v47 }
 0x11f   :  { %699 = vmatprep.subr.bf16.mxu1 %v784_v27 }
 0x122   :  { %700 = vmatpush3.bf16.msra.mxu1 %v770_v48 }
 0x123   :  { %701 = vmatprep.subr.bf16.mxu1 %v784_v27 }
 0x126   :  { %702 = vmatpush3.bf16.msra.mxu1 %v771_v49 }
 0x127   :  { %703 = vmatprep.subr.bf16.mxu1 %v784_v27 }
 0x12a   :  { %704 = vmatpush3.bf16.msra.mxu1 %v772_v50 }
 0x12b   :  { %705 = vmatprep.subr.bf16.mxu1 %v784_v27 }
 0x12e   :  { %706 = vmatpush3.bf16.msra.mxu1 %v773_v51 }
 0x12f   :  { %707 = vmatprep.subr.bf16.mxu1 %v784_v27 }
 0x132   :  { %708 = vmatpush3.bf16.msra.mxu1 %v774_v52 }
 0x135   :  { %710 = vmatmul.mubr.bf16.vlgmr.msra.gmra.mrb[4].mxu1 %v194_v55 }
 0x1e8   :  { %v669_v0 = vpop.f32.mrb[0].mxu1 }
 0x1e9   :  { %v670_v1 = vpop.f32.mrb[1].mxu1 }
 0x1ea   :  { %v671_v2 = vadd.f32 %v670_v1, %v669_v0  ;;  %v672_v3 = vpop.f32.mrb[2].mxu1 }
 0x1eb   :  { %v673_v4 = vpop.f32.mrb[3].mxu1 }
 0x1ec   :  { %v674_v5 = vadd.f32 %v673_v4, %v672_v3  ;;  %v430_v7 = vadd.f32 %v671_v2, %v618_v6 }
 0x1ee   :  { %v433_v11 = vadd.f32 %v674_v5, %v618_v6 }
 0x208   :  { %v470_v8 = vpop.f32.mrb[4].mxu1 }
 0x209   :  { %v471_v9 = vadd.f32 %v470_v8, %v430_v7  ;;  %v711_v10 = vpop.f32.mrb[5].mxu1 }
 0x20a   :  { %v473_v12 = vpop.f32.mrb[6].mxu1 }
 0x20b   :  { %v474_v13 = vadd.f32 %v473_v12, %v433_v11  ;;  %v712_v14 = vpop.f32.mrb[7].mxu1  ;;  %v477_v15 = vmax.f32 %v471_v9, 0.0 }
 0x20d   :  { %v478_v16 = vmax.f32 %v474_v13, 0.0 }
 0x20f   :  { %v479_v17 = vpack.c.bf16 %v478_v16, %v477_v15 }
 0x211   :  { %730 = vmatmul.mubr.bf16.vlgmr.msra.gmra.mrb[4].mxu0 %v479_v17 }
 0x2e4   :  { %v586_v19 = vpop.f32.mrb[4].mxu0 }
 0x2e5   :  { %v587_v20 = vadd.f32 %v644_v18, %v586_v19  ;;  %v731_v21 = vpop.f32.mrb[5].mxu0 }
 0x2e6   :  { %v589_v22 = vpop.f32.mrb[6].mxu0 }
 0x2e7   :  { %v593_v23 = vmax.f32 %v587_v20, 0.0  ;;  %v590_v24 = vadd.f32 %v644_v18, %v589_v22  ;;  %v732_v25 = vpop.f32.mrb[7].mxu0 }
 0x2e9   :  { %595 = vst [vmem:[%s998_s5] sm:$0xff] %v593_v23  ;;  %v594_v26 = vmax.f32 %v590_v24, 0.0 }
 0x2eb   :  { %596 = vst [vmem:[%s998_s5 + $0x8] sm:$0xff] %v594_v26 }

</bundles_post_ra>
